<compile_context>
chip_gen: v5e
topology: v5e:2x2
jax: 0.10.0
libtpu: 0.0.40
codegen_flags: <defaults>
</compile_context>

<pallas_src>
import functools

import jax
import jax.numpy as jnp
from jax.experimental import pallas as pl
from jax.experimental.pallas import tpu as pltpu


# ----------------------------------------------------------------------------
# Kernels
# ----------------------------------------------------------------------------
def _mnbc_gather_kernel(tok_ref, w_ref, b_ref, out_ref):
    """One batch-tile step of the gather fast path (whole vocab row in VMEM).

    tok_ref: (TB, S)  int32   VMEM   token ids for this batch tile
    w_ref:   (1, Vp)  float32 VMEM   zero-padded weight row
    b_ref:   (1,)     float32 SMEM   scalar bias
    out_ref: (TB, 2)  float32 VMEM   [sigmoid(z), sigmoid(-z)]
    """
    tok = tok_ref[...]                                        # (TB, S)
    tb = tok.shape[0]
    vp = w_ref.shape[1]
    w_tab = jnp.broadcast_to(w_ref[...], (tb, vp))            # (TB, Vp)
    vals = jnp.take_along_axis(w_tab, tok, axis=1,
                               mode="promise_in_bounds")      # (TB, S)
    z = jnp.sum(vals, axis=1, keepdims=True) + b_ref[0]       # (TB, 1)
    out_ref[...] = jnp.concatenate(
        [jax.nn.sigmoid(z), jax.nn.sigmoid(-z)], axis=1)


def _mnbc_compare_kernel(tok_ref, w_ref, b_ref, out_ref, acc_ref, *, red_dtype):
    """One (batch-tile, vocab-tile) step of the compare-reduce fallback.

    tok_ref: (TB, S)   int32   VMEM   token ids for this batch tile
    w_ref:   (1, TV)   float32 VMEM   weight chunk (lane-dense)
    b_ref:   (1,)      float32 SMEM   scalar bias
    out_ref: (TB, 2)   float32 VMEM   [sigmoid(z), sigmoid(-z)]
    acc_ref: (TB, 128) float32 VMEM   per-lane partial dot products (scratch)
    """
    j = pl.program_id(1)

    @pl.when(j == 0)
    def _init():
        acc_ref[...] = jnp.zeros_like(acc_ref)

    tok = tok_ref[...]                                        # (TB, S) int32
    w = w_ref[...]                                            # (1, TV) float32
    tv = w.shape[1]

    # Global vocab ids covered by this chunk: [j*TV, j*TV + TV).
    vocab_ids = jax.lax.broadcasted_iota(jnp.int32, (1, 1, tv), 2) + j * tv

    # counts[b, v] = #{s : tok[b, s] == id_v}.  The S-reduction runs in
    # red_dtype (bf16 on v6e/v7x -> packed VALU, exact for S <= 256).
    hits = tok[:, :, None] == vocab_ids                       # (TB, S, TV) bool
    counts = jnp.sum(hits.astype(red_dtype), axis=1)          # (TB, TV)

    # Per-lane partial dot product.  128-lane static slices are whole-vreg
    # selects, so folding TV down to 128 lanes costs (TV/128 - 1) VPU adds and
    # the expensive cross-lane (XLU) reduce is deferred to the finalize step.
    prod = counts.astype(jnp.float32) * w                     # (TB, TV) f32
    part = prod[:, 0:128]
    for c in range(1, tv // 128):
        part = part + prod[:, c * 128:(c + 1) * 128]
    acc_ref[...] += part

    @pl.when(j == pl.num_programs(1) - 1)
    def _finalize():
        z = jnp.sum(acc_ref[...], axis=1, keepdims=True) + b_ref[0]   # (TB, 1)
        # sigmoid(-z) computed directly (not 1 - sigmoid(z)) to preserve
        # relative precision of the negative-class probability.
        out_ref[...] = jnp.concatenate(
            [jax.nn.sigmoid(z), jax.nn.sigmoid(-z)], axis=1)


# ----------------------------------------------------------------------------
# Tile selection
# ----------------------------------------------------------------------------
def _batch_tile_candidates(B):
    """Batch tiles: multiples of 8 dividing B (else B itself); prefer >=2 tiles
    when B >= 16 so the 'parallel' axis can shard across v7x's two TCs."""
    if B % 8 == 0:
        cands = [t for t in range(8, B + 1, 8) if B % t == 0]
    else:
        cands = [B]
    if B >= 16:
        halved = [t for t in cands if t <= B // 2]
        if halved:
            cands = halved
    return cands


def _choose_tiles(B, S, Vp, vmem_budget_bytes=2 * 1024 * 1024):
    """Pick (TB, TV) for the compare-reduce kernel.

    The budget bounds ~3x the 4-byte (TB, S, TV) intermediate (mask + widened
    copy + reduction temp).  TV is capped at 256 and shrunk to 128 before TB is
    reduced; TB stays a multiple of 8 (or B when B is small / not 8-divisible).
    """
    def max_tb_for(tv):
        return max(1, vmem_budget_bytes // (3 * 4 * S * tv))

    TV = 256 if (Vp % 256 == 0 and max_tb_for(256) >= 8) else 128
    max_tb = max_tb_for(TV)

    cands = _batch_tile_candidates(B)
    fitting = [t for t in cands if t <= max_tb]
    # If nothing fits (huge S), take the smallest legal tile and accept it.
    TB = max(fitting) if fitting else min(cands)
    return TB, TV


def _choose_gather_tile(B, Vp, vmem_budget_bytes=4 * 1024 * 1024):
    """Batch tile for the gather path; None if the (TB, Vp) broadcast table
    cannot fit the budget with a legal tile."""
    max_tb = vmem_budget_bytes // (4 * Vp)
    cands = _batch_tile_candidates(B)
    fitting = [t for t in cands if t <= max_tb]
    return max(fitting) if fitting else None


def _fast_bf16_valu():
    """True on generations with a packed bf16 VALU (v6e / v7x)."""
    try:
        kind = jax.devices()[0].device_kind.lower()
    except Exception:
        return False
    return any(tag in kind for tag in ("v6", "v7", "7x"))


# ----------------------------------------------------------------------------
# pallas_call builders
# ----------------------------------------------------------------------------
def _gather_call(tokens, w_row, bias, TB):
    B, S = tokens.shape
    Vp = w_row.shape[1]
    return pl.pallas_call(
        _mnbc_gather_kernel,
        out_shape=jax.ShapeDtypeStruct((B, 2), jnp.float32),
        grid_spec=pltpu.PrefetchScalarGridSpec(
            num_scalar_prefetch=0,
            grid=(B // TB,),
            in_specs=[
                pl.BlockSpec((TB, S), lambda i: (i, 0)),             # tokens
                pl.BlockSpec((1, Vp), lambda i: (0, 0)),             # weights
                pl.BlockSpec(memory_space=pltpu.MemorySpace.SMEM),   # bias
            ],
            out_specs=pl.BlockSpec((TB, 2), lambda i: (i, 0)),
        ),
        compiler_params=pltpu.CompilerParams(
            dimension_semantics=("parallel",),
            vmem_limit_bytes=32 * 1024 * 1024,
        ),
    )(tokens, w_row, bias)


def _compare_call(tokens, w_row, bias, TB, TV, red_dtype):
    B, S = tokens.shape
    Vp = w_row.shape[1]
    kernel = functools.partial(_mnbc_compare_kernel, red_dtype=red_dtype)
    return pl.pallas_call(
        kernel,
        out_shape=jax.ShapeDtypeStruct((B, 2), jnp.float32),
        grid_spec=pltpu.PrefetchScalarGridSpec(
            num_scalar_prefetch=0,
            grid=(B // TB, Vp // TV),
            in_specs=[
                pl.BlockSpec((TB, S), lambda i, j: (i, 0)),          # tokens
                pl.BlockSpec((1, TV), lambda i, j: (0, j)),          # weights
                pl.BlockSpec(memory_space=pltpu.MemorySpace.SMEM),   # bias
            ],
            out_specs=pl.BlockSpec((TB, 2), lambda i, j: (i, 0)),
            scratch_shapes=[pltpu.VMEM((TB, 128), jnp.float32)],
        ),
        compiler_params=pltpu.CompilerParams(
            dimension_semantics=("parallel", "arbitrary"),
            vmem_limit_bytes=32 * 1024 * 1024,
        ),
    )(tokens, w_row, bias)


# ----------------------------------------------------------------------------
# Gather-support probe (one small compile + numeric check per shape)
# ----------------------------------------------------------------------------
_GATHER_PROBE_CACHE = {}


def _gather_supported(S, Vp, TB):
    key = (S, Vp, TB)
    if key not in _GATHER_PROBE_CACHE:
        ok = False
        try:
            k1, k2 = jax.random.split(jax.random.PRNGKey(17))
            toks = jax.random.randint(k1, (TB, S), 0, Vp, dtype=jnp.int32)
            w = jax.random.normal(k2, (1, Vp), dtype=jnp.float32)
            bias = jnp.array([0.25], dtype=jnp.float32)
            got = jax.block_until_ready(_gather_call(toks, w, bias, TB))
            z = jnp.sum(w[0, :][toks], axis=1) + bias[0]
            want = jnp.stack([jax.nn.sigmoid(z), jax.nn.sigmoid(-z)], axis=1)
            ok = bool(jnp.allclose(got, want, atol=1e-5, rtol=1e-5))
        except Exception:
            ok = False
        _GATHER_PROBE_CACHE[key] = ok
    return _GATHER_PROBE_CACHE[key]


# ----------------------------------------------------------------------------
# Public forward
# ----------------------------------------------------------------------------
def mnbc_forward(tokens, w_emb, b, *, force_compare=False):
    """tokens: (B, S) int; w_emb: (V, 1) float; b: (1,) float -> (B, 2) f32."""
    B, S = tokens.shape
    V = w_emb.shape[0]

    tokens = tokens.astype(jnp.int32)
    bias = b.astype(jnp.float32).reshape(1)

    # Pad the vocab to a multiple of 128 so every weight chunk is lane-dense;
    # padded ids carry zero weight and match no in-range token.
    Vp = max(128, ((V + 127) // 128) * 128)
    w_row = jnp.zeros((1, Vp), jnp.float32)
    w_row = w_row.at[0, :V].set(w_emb.astype(jnp.float32).reshape(V))

    # Fast path: real embedding gather (O(B*S) work) when Mosaic lowers it and
    # the (TB, Vp) broadcast table fits the VMEM budget.
    if not force_compare:
        tb_g = _choose_gather_tile(B, Vp)
        if tb_g is not None and _gather_supported(S, Vp, tb_g):
            return _gather_call(tokens, w_row, bias, tb_g)

    # Fallback: vocab-chunked compare-and-count (O(B*S*V) VPU work).
    TB, TV = _choose_tiles(B, S, Vp)
    if _fast_bf16_valu() and S <= 256:
        # Packed bf16 VALU on v6e/v7x: ~2x throughput on the dominant
        # widen+sum over (TB, S, TV); counts <= S are exact in bf16.
        try:
            return jax.block_until_ready(
                _compare_call(tokens, w_row, bias, TB, TV, jnp.bfloat16))
        except Exception:
            pass
    return _compare_call(tokens, w_row, bias, TB, TV, jnp.float32)


def mnbc_reference(tokens, w_emb, b):
    emb_prod = w_emb[tokens, 0]                       # (B, S)
    z = jnp.sum(emb_prod, axis=1) + b[0]              # (B,)
    return jnp.stack([jax.nn.sigmoid(z), jax.nn.sigmoid(-z)], axis=1)


if __name__ == "__main__":
    key = jax.random.PRNGKey(0)
    k_tok, k_w = jax.random.split(key)

    vocab_size = 32
    B, S = 8, 16

    tokens = jax.random.randint(k_tok, (B, S), 0, vocab_size, dtype=jnp.int32)
    # nn.Embedding default init ~ N(0, 1); bias initialized to zero as in __init__.
    w_emb = jax.random.normal(k_w, (vocab_size, 1), dtype=jnp.float32)
    b = jnp.zeros((1,), dtype=jnp.float32)

    ref = mnbc_reference(tokens, w_emb, b)

    out = jax.block_until_ready(mnbc_forward(tokens, w_emb, b))
    assert out.shape == (B, 2)
    assert jnp.allclose(out, ref, atol=1e-5, rtol=1e-5)

    # Also exercise the vocab-chunked compare-reduce fallback (used for large
    # vocabularies / when Mosaic rejects the gather) so both kernels are
    # compiled and validated on device.
    out_fb = jax.block_until_ready(mnbc_forward(tokens, w_emb, b, force_compare=True))
    assert jnp.allclose(out_fb, ref, atol=1e-5, rtol=1e-5)

    print("KERNEL_OK")
</pallas_src>

<mosaic_0001>
module attributes {stable_mosaic.version = 11 : i64} {
  func.func @_mnbc_gather_kernel(%arg0: i32, %arg1: memref<8x16xi32, #tpu.memory_space<vmem>>, %arg2: memref<1x128xf32, #tpu.memory_space<vmem>>, %arg3: memref<1xf32, #tpu.memory_space<smem>>, %arg4: memref<8x2xf32, #tpu.memory_space<vmem>>) attributes {dimension_semantics = [#tpu.dimension_semantics<parallel>], iteration_bounds = array<i64: 1>, scalar_prefetch = 0 : i64, scratch_operands = 0 : i64, tpu.core_type = #tpu.core_type<tc>, window_params = [{transform_indices = @transform_0, window_bounds = array<i64: 8, 16>}, {pipeline_mode = #tpu.pipeline_mode<synchronous>, transform_indices = @transform_1, window_bounds = array<i64: 1, 128>}, {transform_indices = @transform_2, window_bounds = array<i64: 1>}, {transform_indices = @transform_3, window_bounds = array<i64: 8, 2>}]} {
    %c0 = arith.constant 0 : index
    %c0_0 = arith.constant 0 : index
    %0 = vector.load %arg1[%c0, %c0_0] : memref<8x16xi32, #tpu.memory_space<vmem>>, vector<8x16xi32>
    %c0_1 = arith.constant 0 : index
    %c0_2 = arith.constant 0 : index
    %1 = vector.load %arg2[%c0_1, %c0_2] : memref<1x128xf32, #tpu.memory_space<vmem>>, vector<1x128xf32>
    %2 = vector.shape_cast %1 : vector<1x128xf32> to vector<1x128xf32>
    %3 = vector.broadcast %2 : vector<1x128xf32> to vector<8x128xf32>
    %4 = vector.shape_cast %0 : vector<8x16xi32> to vector<8x16x1xi32>
    %5 = vector.shape_cast %4 : vector<8x16x1xi32> to vector<8x16xi32>
    %6 = tpu.dynamic_gather %3[%5] in [1] : vector<8x128xf32>, vector<8x16xi32> -> vector<8x16xf32>
    %cst = arith.constant dense<0.000000e+00> : vector<8xf32>
    %7 = vector.multi_reduction <add>, %6, %cst [1] : vector<8x16xf32> to vector<8xf32>
    %8 = vector.shape_cast %7 : vector<8xf32> to vector<8x1xf32>
    %c0_3 = arith.constant 0 : index
    %9 = memref.load %arg3[%c0_3] : memref<1xf32, #tpu.memory_space<smem>>
    %10 = vector.broadcast %9 : f32 to vector<8x1xf32>
    %11 = arith.addf %8, %10 : vector<8x1xf32>
    %12 = arith.negf %11 : vector<8x1xf32>
    %13 = math.exp %12 : vector<8x1xf32>
    %cst_4 = arith.constant 1.000000e+00 : f32
    %14 = vector.broadcast %cst_4 : f32 to vector<8x1xf32>
    %15 = arith.addf %14, %13 : vector<8x1xf32>
    %16 = arith.divf %14, %15 : vector<8x1xf32>
    %cst_5 = arith.constant 0.000000e+00 : f32
    %17 = vector.broadcast %cst_5 : f32 to vector<8x1xf32>
    %18 = arith.subf %17, %11 : vector<8x1xf32>
    %19 = arith.negf %18 : vector<8x1xf32>
    %20 = math.exp %19 : vector<8x1xf32>
    %cst_6 = arith.constant 1.000000e+00 : f32
    %21 = vector.broadcast %cst_6 : f32 to vector<8x1xf32>
    %22 = arith.addf %21, %20 : vector<8x1xf32>
    %23 = arith.divf %21, %22 : vector<8x1xf32>
    %24 = tpu.concatenate %16, %23 in 1 : vector<8x1xf32>, vector<8x1xf32> -> vector<8x2xf32>
    %c0_7 = arith.constant 0 : index
    %c0_8 = arith.constant 0 : index
    %25 = vector.load %arg4[%c0_7, %c0_8] : memref<8x2xf32, #tpu.memory_space<vmem>>, vector<8x2xf32>
    tpu.vector_store %arg4[%c0_7, %c0_8], %24 {strides = array<i32>} : memref<8x2xf32, #tpu.memory_space<vmem>>, vector<8x2xf32>,
    return
  }
  func.func @transform_0(%arg0: i32) -> (i32, i32) {
    %c0_i32 = arith.constant 0 : i32
    %c0_i32_0 = arith.constant 0 : i32
    return %arg0, %c0_i32 : i32, i32
  }
  func.func @transform_1(%arg0: i32) -> (i32, i32) {
    %c0_i32 = arith.constant 0 : i32
    %c0_i32_0 = arith.constant 0 : i32
    %c0_i32_1 = arith.constant 0 : i32
    return %c0_i32, %c0_i32_0 : i32, i32
  }
  func.func @transform_2(%arg0: i32) -> i32 {
    %c0_i32 = arith.constant 0 : i32
    %c0_i32_0 = arith.constant 0 : i32
    return %c0_i32 : i32
  }
  func.func @transform_3(%arg0: i32) -> (i32, i32) {
    %c0_i32 = arith.constant 0 : i32
    %c0_i32_0 = arith.constant 0 : i32
    return %arg0, %c0_i32 : i32, i32
  }
}

module attributes {stable_mosaic.version = 11 : i64} {
  func.func @_mnbc_compare_kernel(%arg0: i32, %arg1: i32, %arg2: memref<8x16xi32, #tpu.memory_space<vmem>>, %arg3: memref<1x128xf32, #tpu.memory_space<vmem>>, %arg4: memref<1xf32, #tpu.memory_space<smem>>, %arg5: memref<8x2xf32, #tpu.memory_space<vmem>>, %arg6: memref<8x128xf32, #tpu.memory_space<vmem>>) attributes {dimension_semantics = [#tpu.dimension_semantics<parallel>, #tpu.dimension_semantics<arbitrary>], iteration_bounds = array<i64: 1, 1>, scalar_prefetch = 0 : i64, scratch_operands = 1 : i64, tpu.core_type = #tpu.core_type<tc>, window_params = [{transform_indices = @transform_0, window_bounds = array<i64: 8, 16>}, {transform_indices = @transform_1, window_bounds = array<i64: 1, 128>}, {transform_indices = @transform_2, window_bounds = array<i64: 1>}, {transform_indices = @transform_3, window_bounds = array<i64: 8, 2>}]} {
    %c0_i32 = arith.constant 0 : i32
    %0 = arith.cmpi eq, %arg1, %c0_i32 : i32
    %1 = arith.extui %0 : i1 to i32
    %c0_i32_0 = arith.constant 0 : i32
    %2 = arith.cmpi ne, %1, %c0_i32_0 : i32
    scf.if %2 {
      %cst_10 = arith.constant 0.000000e+00 : f32
      %24 = vector.broadcast %cst_10 : f32 to vector<8x128xf32>
      %c0_11 = arith.constant 0 : index
      %c0_12 = arith.constant 0 : index
      %25 = vector.load %arg6[%c0_11, %c0_12] : memref<8x128xf32, #tpu.memory_space<vmem>>, vector<8x128xf32>
      tpu.vector_store %arg6[%c0_11, %c0_12], %24 {strides = array<i32>} : memref<8x128xf32, #tpu.memory_space<vmem>>, vector<8x128xf32>,
    } else {
    }
    %c0 = arith.constant 0 : index
    %c0_1 = arith.constant 0 : index
    %3 = vector.load %arg2[%c0, %c0_1] : memref<8x16xi32, #tpu.memory_space<vmem>>, vector<8x16xi32>
    %c0_2 = arith.constant 0 : index
    %c0_3 = arith.constant 0 : index
    %4 = vector.load %arg3[%c0_2, %c0_3] : memref<1x128xf32, #tpu.memory_space<vmem>>, vector<1x128xf32>
    %5 = tpu.iota {dimensions = array<i32: 2>} : vector<1x1x128xi32>
    %c128_i32 = arith.constant 128 : i32
    %6 = arith.muli %arg1, %c128_i32 : i32
    %7 = vector.broadcast %6 : i32 to vector<1x1x128xi32>
    %8 = arith.addi %5, %7 : vector<1x1x128xi32>
    %9 = vector.shape_cast %3 : vector<8x16xi32> to vector<8x16x1xi32>
    %10 = vector.broadcast %9 : vector<8x16x1xi32> to vector<8x16x128xi32>
    %11 = vector.broadcast %8 : vector<1x1x128xi32> to vector<8x16x128xi32>
    %12 = arith.cmpi eq, %10, %11 : vector<8x16x128xi32>
    %13 = arith.extui %12 : vector<8x16x128xi1> to vector<8x16x128xi32>
    %14 = arith.sitofp %13 : vector<8x16x128xi32> to vector<8x16x128xf32>
    %cst = arith.constant dense<0.000000e+00> : vector<8x128xf32>
    %15 = vector.multi_reduction <add>, %14, %cst [1] : vector<8x16x128xf32> to vector<8x128xf32>
    %16 = vector.broadcast %4 : vector<1x128xf32> to vector<8x128xf32>
    %17 = arith.mulf %15, %16 : vector<8x128xf32>
    %c0_4 = arith.constant 0 : index
    %c0_5 = arith.constant 0 : index
    %18 = vector.load %arg6[%c0_4, %c0_5] : memref<8x128xf32, #tpu.memory_space<vmem>>, vector<8x128xf32>
    %19 = arith.addf %18, %17 : vector<8x128xf32>
    %c0_6 = arith.constant 0 : index
    %c0_7 = arith.constant 0 : index
    %20 = vector.load %arg6[%c0_6, %c0_7] : memref<8x128xf32, #tpu.memory_space<vmem>>, vector<8x128xf32>
    tpu.vector_store %arg6[%c0_6, %c0_7], %19 {strides = array<i32>} : memref<8x128xf32, #tpu.memory_space<vmem>>, vector<8x128xf32>,
    %c0_i32_8 = arith.constant 0 : i32
    %21 = arith.cmpi eq, %arg1, %c0_i32_8 : i32
    %22 = arith.extui %21 : i1 to i32
    %c0_i32_9 = arith.constant 0 : i32
    %23 = arith.cmpi ne, %22, %c0_i32_9 : i32
    scf.if %23 {
      %c0_10 = arith.constant 0 : index
      %c0_11 = arith.constant 0 : index
      %24 = vector.load %arg6[%c0_10, %c0_11] : memref<8x128xf32, #tpu.memory_space<vmem>>, vector<8x128xf32>
      %cst_12 = arith.constant dense<0.000000e+00> : vector<8xf32>
      %25 = vector.multi_reduction <add>, %24, %cst_12 [1] : vector<8x128xf32> to vector<8xf32>
      %26 = vector.shape_cast %25 : vector<8xf32> to vector<8x1xf32>
      %c0_13 = arith.constant 0 : index
      %27 = memref.load %arg4[%c0_13] : memref<1xf32, #tpu.memory_space<smem>>
      %28 = vector.broadcast %27 : f32 to vector<8x1xf32>
      %29 = arith.addf %26, %28 : vector<8x1xf32>
      %30 = arith.negf %29 : vector<8x1xf32>
      %31 = math.exp %30 : vector<8x1xf32>
      %cst_14 = arith.constant 1.000000e+00 : f32
      %32 = vector.broadcast %cst_14 : f32 to vector<8x1xf32>
      %33 = arith.addf %32, %31 : vector<8x1xf32>
      %34 = arith.divf %32, %33 : vector<8x1xf32>
      %cst_15 = arith.constant 0.000000e+00 : f32
      %35 = vector.broadcast %cst_15 : f32 to vector<8x1xf32>
      %36 = arith.subf %35, %29 : vector<8x1xf32>
      %37 = arith.negf %36 : vector<8x1xf32>
      %38 = math.exp %37 : vector<8x1xf32>
      %cst_16 = arith.constant 1.000000e+00 : f32
      %39 = vector.broadcast %cst_16 : f32 to vector<8x1xf32>
      %40 = arith.addf %39, %38 : vector<8x1xf32>
      %41 = arith.divf %39, %40 : vector<8x1xf32>
      %42 = tpu.concatenate %34, %41 in 1 : vector<8x1xf32>, vector<8x1xf32> -> vector<8x2xf32>
      %c0_17 = arith.constant 0 : index
      %c0_18 = arith.constant 0 : index
      %43 = vector.load %arg5[%c0_17, %c0_18] : memref<8x2xf32, #tpu.memory_space<vmem>>, vector<8x2xf32>
      tpu.vector_store %arg5[%c0_17, %c0_18], %42 {strides = array<i32>} : memref<8x2xf32, #tpu.memory_space<vmem>>, vector<8x2xf32>,
    } else {
    }
    return
  }
  func.func @transform_0(%arg0: i32, %arg1: i32) -> (i32, i32) {
    %c0_i32 = arith.constant 0 : i32
    %c0_i32_0 = arith.constant 0 : i32
    return %arg0, %c0_i32 : i32, i32
  }
  func.func @transform_1(%arg0: i32, %arg1: i32) -> (i32, i32) {
    %c0_i32 = arith.constant 0 : i32
    %c0_i32_0 = arith.constant 0 : i32
    return %c0_i32, %arg1 : i32, i32
  }
  func.func @transform_2(%arg0: i32, %arg1: i32) -> i32 {
    %c0_i32 = arith.constant 0 : i32
    %c0_i32_0 = arith.constant 0 : i32
    return %c0_i32 : i32
  }
  func.func @transform_3(%arg0: i32, %arg1: i32) -> (i32, i32) {
    %c0_i32 = arith.constant 0 : i32
    %c0_i32_0 = arith.constant 0 : i32
    return %arg0, %c0_i32 : i32, i32
  }
}

</mosaic_0001>

<bundles_post_ra>
// kernel: tpu_custom_call.1
= control target key start
LH: loop header
LB: loop body
LE: loop exit
PB: predicated region body
PF: predicated region fallthrough
CT: control target
= control target key end

     0   :  { %9 = vsyncpa [#allocation4], 0  ;;  %s131_s15 = smov [#allocation3]   ;;  %s164_s0 = inlined_call_operand.hbm [shape: s32[8,16], index: 0, kind: input, shape index: {}]   ;;  %s165_s1 = inlined_call_operand.vmem [shape: f32[1,128], index: 1, kind: input, shape index: {}]   ;;  %s166_s2 = inlined_call_operand.<no memory space> [shape: f32[1], index: 2, kind: input, shape index: {}]   ;;  %s167_s3 = inlined_call_operand.vmem [shape: f32[8,2], index: 3, kind: output, shape index: {}]  }
   0x1   :  { %s15_s14 = sshll.u32 %s164_s0, 4  ;;  %s17_s16 = sshll.u32 %s131_s15, 4  ;;  %s16_s14 = int_to_ptr.hbm [resolvable:$true] %s15_s14  ;;  %s18_s16 = int_to_ptr.vmem [resolvable:$true] %s17_s16 }
   0x2   :  { %20 = dma.hbm_to_vmem [thread:$0]  %s16_s14, 128, %s18_s16, [#allocation4]  }
   0x3   :  { %129 = dma.done.wait [#allocation4], 128  }
   0x4   :  { %130 = vsyncadd [#allocation4], 4294967168  ;;  %v29_v0 = vld [vmem:[#allocation3] sm:$0xff]  ;;  %vm37_vm0 = vcmask 130048   ;;  %v42_v4 = vstv %s166_s2  ;;  %vm83_vm6 = vcmask 7168   ;;  %vm85_vm8 = vcmask 15360  }
   0x5   :  { %95 = vset.pattern.permute.xlu0 %v29_v0  ;;  %v96_v1 = vld [vmem:[%s165_s1] ss:$0 sm:$0xff] }
   0xd   :  { %35 = vperm.xlu0 %95, %v96_v1  }
  0x7f   :  { %v36_v2 = vpop.permute.xlu0 %35 }
  0x80   :  { %v38_v3 = vsel %vm37_vm0, %v36_v2, 0.0 }
  0x81   :  { %39 = vadd.xlane.f32.xlu0 %v38_v3 }
  0xf4   :  { %v40_v5 = vpop.xlane.xlu0 %39 }
  0xf5   :  { %v43_v6 = vadd.f32 %v42_v4, %v40_v5 }
  0xf7   :  { %v92_v7 = vmul.f32 -1.442695, %v43_v6  ;;  %v63_v8 = vsub.f32 0.0, %v43_v6 }
  0xf9   :  { %97 = vpow2.f32 %v92_v7  ;;  %v93_v9 = vmul.f32 -1.442695, %v63_v8 }
  0xfb   :  { %99 = vpow2.f32 %v93_v9 }
  0xff   :  { %v98_v10 = vpop.eup %97 }
 0x100   :  { %v47_v11 = vadd.f32 1.0, %v98_v10 }
 0x101   :  { %v100_v12 = vpop.eup %99 }
 0x102   :  { %101 = vrcp.f32 %v47_v11  ;;  %v67_v13 = vadd.f32 1.0, %v100_v12  ;;  %vm53_vm2 = vweird.f32 %v47_v11  ;;  %v59_v22 = vand.u32 2147483648, %v47_v11 }
 0x103   :  { %v57_v24 = vand.u32 2147483647, %v47_v11 }
 0x104   :  { %103 = vrcp.f32 %v67_v13  ;;  %v79_v23 = vand.u32 2147483648, %v67_v13  ;;  %v77_v26 = vand.u32 2147483647, %v67_v13  ;;  %vm73_vm5 = vweird.f32 %v67_v13 }
 0x105   :  { %v60_v29 = vor.u32 1.1754944e-38, %v59_v22  ;;  %vm58_vm9 = vcmp.eq.f32.partialorder %v57_v24, 8.507059e+37 }
 0x106   :  { %v80_v30 = vor.u32 1.1754944e-38, %v79_v23  ;;  %vm78_vm10 = vcmp.eq.f32.partialorder %v77_v26, 8.507059e+37 }
 0x108   :  { %v102_v14 = vpop.eup %101 }
 0x109   :  { %v49_v15 = vmul.f32 %v102_v14, %v47_v11  ;;  %vm54_vm1 = vweird.f32 %v102_v14 }
 0x10a   :  { %v104_v16 = vpop.eup %103  ;;  %vm55_vm4 = vmor %vm53_vm2, %vm54_vm1 }
 0x10b   :  { %v50_v17 = vsub.f32 1.0, %v49_v15  ;;  %v69_v18 = vmul.f32 %v104_v16, %v67_v13  ;;  %vm74_vm3 = vweird.f32 %v104_v16 }
 0x10c   :  { %vm75_vm7 = vmor %vm73_vm5, %vm74_vm3 }
 0x10d   :  { %v51_v19 = vmul.f32 %v102_v14, %v50_v17  ;;  %v70_v20 = vsub.f32 1.0, %v69_v18 }
 0x10f   :  { %v52_v21 = vadd.f32 %v102_v14, %v51_v19  ;;  %v71_v25 = vmul.f32 %v104_v16, %v70_v20 }
 0x111   :  { %v56_v27 = vsel %vm55_vm4, %v102_v14, %v52_v21  ;;  %v72_v28 = vadd.f32 %v104_v16, %v71_v25 }
 0x112   :  { %v61_v32 = vsel %vm58_vm9, %v60_v29, %v56_v27 }
 0x113   :  { %v76_v31 = vsel %vm75_vm7, %v104_v16, %v72_v28 }
 0x114   :  { %v81_v33 = vsel %vm78_vm10, %v80_v30, %v76_v31 }
 0x115   :  { %v84_v34 = vsel %vm83_vm6, %v61_v32, %v81_v33 }
 0x116   :  { %86 = vst.msk [vmem:[%s167_s3] sm:$0xff] %vm85_vm8, %v84_v34 }
 0x117   :  { %91 = vsyncpa [#allocation4], 1 }

// kernel: tpu_custom_call.1
= control target key start
LH: loop header
LB: loop body
LE: loop exit
PB: predicated region body
PF: predicated region fallthrough
CT: control target
= control target key end

     0   :  { %9 = vsyncpa [#allocation5], 0  ;;  %s416_s15 = smov [#allocation4]   ;;  %s484_s0 = inlined_call_operand.hbm [shape: s32[8,16], index: 0, kind: input, shape index: {}]   ;;  %s485_s1 = inlined_call_operand.vmem [shape: f32[1,128], index: 1, kind: input, shape index: {}]   ;;  %s486_s2 = inlined_call_operand.<no memory space> [shape: f32[1], index: 2, kind: input, shape index: {}]   ;;  %s487_s3 = inlined_call_operand.vmem [shape: f32[8,2], index: 3, kind: output, shape index: {}]  }
   0x1   :  { %s15_s14 = sshll.u32 %s484_s0, 4  ;;  %s17_s16 = sshll.u32 %s416_s15, 4  ;;  %s16_s14 = int_to_ptr.hbm [resolvable:$true] %s15_s14  ;;  %s18_s16 = int_to_ptr.vmem [resolvable:$true] %s17_s16 }
   0x2   :  { %20 = dma.hbm_to_vmem [thread:$0]  %s16_s14, 128, %s18_s16, [#allocation5]  }
   0x3   :  { %414 = dma.done.wait [#allocation5], 128  }
   0x4   :  { %415 = vsyncadd [#allocation5], 4294967168  ;;  %v36_v0 = vlaneseq  ;;  %v34_v2 = vld [vmem:[#allocation4] sm:$0xff]  ;;  %v417_v23 = vmov 0.0  }
   0x5   :  { %v67_v3 = vperm.slane %v34_v2, 2  ;;  %v54_v4 = vperm.slane %v34_v2, 1  ;;  %v41_v5 = vperm.slane %v34_v2, 0  ;;  %v93_v7 = vperm.slane %v34_v2, 4 }
   0x6   :  { %v43_v1 = vshrl.u32 %v36_v0, 7  ;;  %v80_v8 = vperm.slane %v34_v2, 3  ;;  %v119_v9 = vperm.slane %v34_v2, 6  ;;  %v106_v10 = vperm.slane %v34_v2, 5 }
   0x7   :  { %v132_v11 = vperm.slane %v34_v2, 7  ;;  %v441_v20 = vand.u32 127, %v36_v0 }
   0x8   :  { %371 = vset.pattern.permute.xlu1 %v43_v1  ;;  %370 = vset.pattern.permute.xlu0 %v43_v1  ;;  %v50_v6 = vadd.s32 8, %v43_v1 }
   0x9   :  { %372 = vset.pattern.permute.xlu2 %v43_v1 }
  0x10   :  { %72 = vperm.xlu1 %371, %v67_v3   ;;  %59 = vperm.xlu0 %370, %v54_v4  }
  0x11   :  { %46 = vperm.xlu2 %372, %v41_v5  }
  0x18   :  { %373 = vset.pattern.permute.xlu1 %v50_v6  ;;  %98 = vperm.xlu0 %370, %v93_v7  }
  0x19   :  { %375 = vset.pattern.permute.xlu2 %v50_v6 }
  0x20   :  { %78 = vperm.xlu1 %373, %v67_v3   ;;  %376 = vset.pattern.permute.xlu0 %v50_v6 }
  0x21   :  { %52 = vperm.xlu2 %375, %v41_v5  }
  0x28   :  { %374 = vset.pattern.permute.xlu1 %v43_v1  ;;  %65 = vperm.xlu0 %376, %v54_v4  }
  0x29   :  { %91 = vperm.xlu2 %375, %v80_v8  }
  0x30   :  { %85 = vperm.xlu1 %374, %v80_v8   ;;  %130 = vperm.xlu0 %376, %v119_v9  }
  0x31   :  { %378 = vset.pattern.permute.xlu2 %v43_v1 }
  0x38   :  { %377 = vset.pattern.permute.xlu1 %v50_v6 }
  0x39   :  { %111 = vperm.xlu2 %378, %v106_v10  }
  0x40   :  { %104 = vperm.xlu1 %377, %v93_v7  }
  0x41   :  { %124 = vperm.xlu2 %378, %v119_v9  }
  0x48   :  { %117 = vperm.xlu1 %377, %v106_v10  }
  0x49   :  { %380 = vset.pattern.permute.xlu2 %v50_v6 }
  0x50   :  { %379 = vset.pattern.permute.xlu1 %v43_v1 }
  0x51   :  { %143 = vperm.xlu2 %380, %v132_v11  }
  0x58   :  { %137 = vperm.xlu1 %379, %v132_v11  }
  0x6b   :  { %v47_v12 = vpop.permute.xlu2 %46 }
  0x6c   :  { %vm145_vm4 = vcmp.eq.s32.totalorder %v47_v12, %v441_v20 }
  0x6d   :  { %v350_v32 = vsel %vm145_vm4, 1.0, %v417_v23  ;;  %vm282_vm4 = vcmask 1045509  }
  0x7b   :  { %v53_v14 = vpop.permute.xlu2 %52 }
  0x7c   :  { %vm146_vm5 = vcmp.eq.s32.totalorder %v53_v14, %v441_v20 }
  0x7d   :  { %v351_v33 = vsel %vm146_vm5, 1.0, %v417_v23  ;;  %vm285_vm5 = vcmask 1046534  }
  0x7e   :  { %v193_v42 = vadd.f32 %v351_v33, %v350_v32 }
  0x80   :  { %v194_v50 = vrot.slane %v193_v42, 4 }
  0x82   :  { %v60_v13 = vpop.permute.xlu0 %59  ;;  %v73_v15 = vpop.permute.xlu1 %72  ;;  %v195_v59 = vadd.f32 %v194_v50, %v193_v42 }
  0x83   :  { %v92_v17 = vpop.permute.xlu2 %91  ;;  %vm147_vm0 = vcmp.eq.s32.totalorder %v60_v13, %v441_v20  ;;  %vm149_vm7 = vcmp.eq.s32.totalorder %v73_v15, %v441_v20 }
  0x84   :  { %v352_v24 = vsel %vm147_vm0, 1.0, %v417_v23  ;;  %vm152_vm6 = vcmp.eq.s32.totalorder %v92_v17, %v441_v20  ;;  %v354_v36 = vsel %vm149_vm7, 1.0, %v417_v23  ;;  %v196_v3 = vrot.slane %v195_v59, 2 }
  0x85   :  { %v357_v34 = vsel %vm152_vm6, 1.0, %v417_v23  ;;  %vm270_vm0 = vcmask 1041409   ;;  %vm288_vm6 = vcmask 1047559  }
  0x86   :  { %v197_v11 = vadd.f32 %v196_v3, %v195_v59 }
  0x8a   :  { %v99_v16 = vpop.permute.xlu0 %98 }
  0x8b   :  { %vm153_vm8 = vcmp.eq.s32.totalorder %v99_v16, %v441_v20 }
  0x8c   :  { %v358_v37 = vsel %vm153_vm8, 1.0, %v417_v23 }
  0x92   :  { %v79_v18 = vpop.permute.xlu1 %78 }
  0x93   :  { %v112_v21 = vpop.permute.xlu2 %111  ;;  %vm150_vm3 = vcmp.eq.s32.totalorder %v79_v18, %v441_v20 }
  0x94   :  { %v355_v29 = vsel %vm150_vm3, 1.0, %v417_v23  ;;  %vm155_vm12 = vcmp.eq.s32.totalorder %v112_v21, %v441_v20  ;;  %v381_v21 = vld [vmem:[%s485_s1] ss:$0 sm:$0xff]  ;;  %vm279_vm3 = vcmask 1044484  }
  0x95   :  { %v207_v40 = vadd.f32 %v355_v29, %v354_v36  ;;  %v360_v51 = vsel %vm155_vm12, 1.0, %v417_v23  ;;  %vm341_vm12 = vcmask 7168  }
  0x97   :  { %v208_v47 = vrot.slane %v207_v40, 4 }
  0x99   :  { %v209_v57 = vadd.f32 %v208_v47, %v207_v40 }
  0x9a   :  { %v66_v19 = vpop.permute.xlu0 %65 }
  0x9b   :  { %vm148_vm1 = vcmp.eq.s32.totalorder %v66_v19, %v441_v20  ;;  %v125_v31 = vpop.permute.xlu2 %124  ;;  %v210_v1 = vrot.slane %v209_v57, 2 }
  0x9c   :  { %v353_v25 = vsel %vm148_vm1, 1.0, %v417_v23  ;;  %vm157_vm11 = vcmp.eq.s32.totalorder %v125_v31, %v441_v20  ;;  %vm273_vm1 = vcmask 1042434  }
  0x9d   :  { %v200_v26 = vadd.f32 %v353_v25, %v352_v24  ;;  %v362_v46 = vsel %vm157_vm11, 1.0, %v417_v23  ;;  %v211_v9 = vadd.f32 %v210_v1, %v209_v57 }
  0x9f   :  { %v201_v38 = vrot.slane %v200_v26, 4  ;;  %v212_v16 = vrot.slane %v211_v9, 1 }
  0xa1   :  { %v202_v43 = vadd.f32 %v201_v38, %v200_v26 }
  0xa2   :  { %v86_v22 = vpop.permute.xlu1 %85  ;;  %v131_v30 = vpop.permute.xlu0 %130 }
  0xa3   :  { %vm151_vm2 = vcmp.eq.s32.totalorder %v86_v22, %v441_v20  ;;  %vm158_vm10 = vcmp.eq.s32.totalorder %v131_v30, %v441_v20  ;;  %v203_v54 = vrot.slane %v202_v43, 2  ;;  %v198_v22 = vrot.slane %v197_v11, 1 }
  0xa4   :  { %v356_v27 = vsel %vm151_vm2, 1.0, %v417_v23  ;;  %v363_v45 = vsel %vm158_vm10, 1.0, %v417_v23  ;;  %v213_v30 = vadd.f32 %v212_v16, %v211_v9  ;;  %vm276_vm2 = vcmask 1043459  }
  0xa5   :  { %v214_v39 = vadd.f32 %v357_v34, %v356_v27  ;;  %v235_v52 = vadd.f32 %v363_v45, %v362_v46  ;;  %v204_v62 = vadd.f32 %v203_v54, %v202_v43  ;;  %v199_v32 = vadd.f32 %v198_v22, %v197_v11 }
  0xa7   :  { %v215_v44 = vrot.slane %v214_v39, 4  ;;  %v236_v61 = vrot.slane %v235_v52, 4  ;;  %v205_v7 = vrot.slane %v204_v62, 1 }
  0xa9   :  { %v216_v55 = vadd.f32 %v215_v44, %v214_v39  ;;  %v237_v5 = vadd.f32 %v236_v61, %v235_v52  ;;  %v206_v14 = vadd.f32 %v205_v7, %v204_v62  ;;  %v254_v39 = vmul.f32 %v381_v21, %v213_v30 }
  0xaa   :  { %v300_v61 = vstv %s486_s2 }
  0xab   :  { %v217_v63 = vrot.slane %v216_v55, 2  ;;  %v144_v6 = vpop.permute.xlu2 %143  ;;  %v238_v13 = vrot.slane %v237_v5, 2  ;;  %v253_v27 = vmul.f32 %v381_v21, %v206_v14  ;;  %v272_v46 = vrot.slane %v254_v39, 6 }
  0xac   :  { %vm160_vm14 = vcmp.eq.s32.totalorder %v144_v6, %v441_v20 }
  0xad   :  { %v218_v8 = vadd.f32 %v217_v63, %v216_v55  ;;  %v365_v19 = vsel %vm160_vm14, 1.0, %v417_v23  ;;  %v239_v25 = vadd.f32 %v238_v13, %v237_v5  ;;  %v269_v36 = vrot.slane %v253_v27, 7 }
  0xae   :  { %vm343_vm14 = vcmask 15360  }
  0xaf   :  { %v219_v15 = vrot.slane %v218_v8, 1 }
  0xb2   :  { %v105_v28 = vpop.permute.xlu1 %104 }
  0xb3   :  { %vm154_vm9 = vcmp.eq.s32.totalorder %v105_v28, %v441_v20  ;;  %v220_v28 = vadd.f32 %v219_v15, %v218_v8 }
  0xb4   :  { %v359_v35 = vsel %vm154_vm9, 1.0, %v417_v23 }
  0xb5   :  { %v221_v41 = vadd.f32 %v359_v35, %v358_v37  ;;  %v240_v35 = vrot.slane %v239_v25, 1  ;;  %v255_v37 = vmul.f32 %v381_v21, %v220_v28 }
  0xb7   :  { %v222_v48 = vrot.slane %v221_v41, 4  ;;  %v241_v43 = vadd.f32 %v240_v35, %v239_v25 }
  0xb9   :  { %v223_v58 = vadd.f32 %v222_v48, %v221_v41  ;;  %v252_v41 = vmul.f32 %v381_v21, %v199_v32  ;;  %v258_v50 = vmul.f32 %v381_v21, %v241_v43 }
  0xba   :  { %v118_v49 = vpop.permute.xlu1 %117 }
  0xbb   :  { %vm156_vm13 = vcmp.eq.s32.totalorder %v118_v49, %v441_v20  ;;  %v224_v2 = vrot.slane %v223_v58, 2  ;;  %v271_v45 = vsel %vm270_vm0, %v269_v36, %v252_v41  ;;  %v284_v57 = vrot.slane %v258_v50, 2 }
  0xbc   :  { %v361_v53 = vsel %vm156_vm13, 1.0, %v417_v23 }
  0xbd   :  { %v228_v56 = vadd.f32 %v361_v53, %v360_v51  ;;  %v225_v10 = vadd.f32 %v224_v2, %v223_v58  ;;  %v274_v51 = vsel %vm273_vm1, %v272_v46, %v271_v45 }
  0xbf   :  { %v229_v60 = vrot.slane %v228_v56, 4  ;;  %v226_v17 = vrot.slane %v225_v10, 1 }
  0xc1   :  { %v230_v0 = vadd.f32 %v229_v60, %v228_v56  ;;  %v227_v31 = vadd.f32 %v226_v17, %v225_v10 }
  0xc3   :  { %v231_v4 = vrot.slane %v230_v0, 2  ;;  %v256_v40 = vmul.f32 %v381_v21, %v227_v31 }
  0xc5   :  { %v232_v12 = vadd.f32 %v231_v4, %v230_v0  ;;  %v278_v47 = vrot.slane %v256_v40, 4 }
  0xc7   :  { %v233_v24 = vrot.slane %v232_v12, 1 }
  0xc9   :  { %v234_v33 = vadd.f32 %v233_v24, %v232_v12 }
  0xca   :  { %v138_v18 = vpop.permute.xlu1 %137 }
  0xcb   :  { %vm159_vm15 = vcmp.eq.s32.totalorder %v138_v18, %v441_v20  ;;  %v257_v42 = vmul.f32 %v381_v21, %v234_v33 }
  0xcc   :  { %v364_v26 = vsel %vm159_vm15, 1.0, %v417_v23  ;;  %v275_v23 = vrot.slane %v255_v37, 5 }
  0xcd   :  { %v242_v29 = vadd.f32 %v365_v19, %v364_v26  ;;  %v281_v49 = vrot.slane %v257_v42, 3 }
  0xce   :  { %v277_v53 = vsel %vm276_vm2, %v275_v23, %v274_v51 }
  0xcf   :  { %v243_v34 = vrot.slane %v242_v29, 4  ;;  %v280_v54 = vsel %vm279_vm3, %v278_v47, %v277_v53 }
  0xd0   :  { %v283_v56 = vsel %vm282_vm4, %v281_v49, %v280_v54 }
  0xd1   :  { %v244_v38 = vadd.f32 %v243_v34, %v242_v29  ;;  %v286_v59 = vsel %vm285_vm5, %v284_v57, %v283_v56 }
  0xd3   :  { %v245_v20 = vrot.slane %v244_v38, 2 }
  0xd5   :  { %v246_v44 = vadd.f32 %v245_v20, %v244_v38 }
  0xd7   :  { %v247_v48 = vrot.slane %v246_v44, 1 }
  0xd9   :  { %v248_v52 = vadd.f32 %v247_v48, %v246_v44 }
  0xdb   :  { %v259_v55 = vmul.f32 %v381_v21, %v248_v52 }
  0xdd   :  { %v287_v58 = vrot.slane %v259_v55, 1 }
  0xdf   :  { %v289_v60 = vsel %vm288_vm6, %v287_v58, %v286_v59 }
  0xe0   :  { %297 = vadd.xlane.f32.xlu1 %v289_v60 }
 0x153   :  { %v298_v62 = vpop.xlane.xlu1 %297 }
 0x154   :  { %v301_v63 = vadd.f32 %v300_v61, %v298_v62 }
 0x156   :  { %v366_v0 = vmul.f32 -1.442695, %v301_v63  ;;  %v321_v1 = vsub.f32 0.0, %v301_v63 }
 0x158   :  { %382 = vpow2.f32 %v366_v0  ;;  %v367_v2 = vmul.f32 -1.442695, %v321_v1 }
 0x15a   :  { %384 = vpow2.f32 %v367_v2 }
 0x15e   :  { %v383_v3 = vpop.eup %382 }
 0x15f   :  { %v305_v4 = vadd.f32 1.0, %v383_v3 }
 0x160   :  { %v385_v5 = vpop.eup %384 }
 0x161   :  { %386 = vrcp.f32 %v305_v4  ;;  %v325_v6 = vadd.f32 1.0, %v385_v5  ;;  %vm311_vm8 = vweird.f32 %v305_v4  ;;  %v317_v15 = vand.u32 2147483648, %v305_v4 }
 0x162   :  { %v315_v17 = vand.u32 2147483647, %v305_v4 }
 0x163   :  { %388 = vrcp.f32 %v325_v6  ;;  %v337_v16 = vand.u32 2147483648, %v325_v6  ;;  %v335_v19 = vand.u32 2147483647, %v325_v6  ;;  %vm331_vm11 = vweird.f32 %v325_v6 }
 0x164   :  { %v318_v24 = vor.u32 1.1754944e-38, %v317_v15  ;;  %vm316_vm15 = vcmp.eq.f32.partialorder %v315_v17, 8.507059e+37 }
 0x165   :  { %v338_v25 = vor.u32 1.1754944e-38, %v337_v16  ;;  %vm336_vm0 = vcmp.eq.f32.partialorder %v335_v19, 8.507059e+37 }
 0x167   :  { %v387_v7 = vpop.eup %386 }
 0x168   :  { %v307_v8 = vmul.f32 %v387_v7, %v305_v4  ;;  %vm312_vm7 = vweird.f32 %v387_v7 }
 0x169   :  { %v389_v9 = vpop.eup %388  ;;  %vm313_vm10 = vmor %vm311_vm8, %vm312_vm7 }
 0x16a   :  { %v308_v10 = vsub.f32 1.0, %v307_v8  ;;  %v327_v11 = vmul.f32 %v389_v9, %v325_v6  ;;  %vm332_vm9 = vweird.f32 %v389_v9 }
 0x16b   :  { %vm333_vm13 = vmor %vm331_vm11, %vm332_vm9 }
 0x16c   :  { %v309_v12 = vmul.f32 %v387_v7, %v308_v10  ;;  %v328_v13 = vsub.f32 1.0, %v327_v11 }
 0x16e   :  { %v310_v14 = vadd.f32 %v387_v7, %v309_v12  ;;  %v329_v18 = vmul.f32 %v389_v9, %v328_v13 }
 0x170   :  { %v314_v21 = vsel %vm313_vm10, %v387_v7, %v310_v14  ;;  %v330_v22 = vadd.f32 %v389_v9, %v329_v18 }
 0x171   :  { %v319_v27 = vsel %vm316_vm15, %v318_v24, %v314_v21 }
 0x172   :  { %v334_v26 = vsel %vm333_vm13, %v389_v9, %v330_v22 }
 0x173   :  { %v339_v28 = vsel %vm336_vm0, %v338_v25, %v334_v26 }
 0x174   :  { %v342_v29 = vsel %vm341_vm12, %v319_v27, %v339_v28 }
 0x175   :  { %344 = vst.msk [vmem:[%s487_s3] sm:$0xff] %vm343_vm14, %v342_v29 }
 0x176   :  { %349 = vsyncpa [#allocation5], 1 }

</bundles_post_ra>
